<compile_context>
chip_gen: v5e
topology: v5e:2x2
jax: 0.10.0
libtpu: 0.0.40
codegen_flags: <defaults>
</compile_context>

<pallas_src>
import functools

import jax
import jax.numpy as jnp
from jax.experimental import pallas as pl
from jax.experimental.pallas import tpu as pltpu


def _round_up(x, m):
    return ((x + m - 1) // m) * m


def _vmem_capacity_bytes():
    """Per-core VMEM capacity; conservative 64 MiB fallback (v7x per-TC)."""
    try:
        return int(pltpu.get_tpu_info().vmem_capacity_bytes)
    except Exception:
        return 64 * 1024 * 1024


# ---------------------------------------------------------------------------
# Kernels: fused Linear -> ReLU -> Linear -> ReLU -> Linear on one batch tile.
# ---------------------------------------------------------------------------
def mlp_kernel_regs(x_ref, w1_ref, b1_ref, w2_ref, b2_ref, w3_ref, b3_ref,
                    o_ref):
    """Small-tile variant: y1/y2 stay in vregs (no VMEM staging round-trip)."""
    cdt = w1_ref.dtype
    y1 = jnp.dot(x_ref[...], w1_ref[...], preferred_element_type=jnp.float32)
    y1 = jnp.maximum(y1 + b1_ref[...], 0.0).astype(cdt)
    y2 = jnp.dot(y1, w2_ref[...], preferred_element_type=jnp.float32)
    y2 = jnp.maximum(y2 + b2_ref[...], 0.0).astype(cdt)
    y3 = jnp.dot(y2, w3_ref[...], preferred_element_type=jnp.float32)
    o_ref[...] = (y3 + b3_ref[...]).astype(o_ref.dtype)


def mlp_kernel_scratch(x_ref, w1_ref, b1_ref, w2_ref, b2_ref, w3_ref, b3_ref,
                       o_ref, y1_ref, y2_ref):
    """Large-tile variant: y1/y2 staged through compute-dtype VMEM scratch."""
    cdt = w1_ref.dtype
    y1 = jnp.dot(x_ref[...], w1_ref[...], preferred_element_type=jnp.float32)
    y1_ref[...] = jnp.maximum(y1 + b1_ref[...], 0.0).astype(cdt)
    y2 = jnp.dot(y1_ref[...], w2_ref[...], preferred_element_type=jnp.float32)
    y2_ref[...] = jnp.maximum(y2 + b2_ref[...], 0.0).astype(cdt)
    y3 = jnp.dot(y2_ref[...], w3_ref[...], preferred_element_type=jnp.float32)
    o_ref[...] = (y3 + b3_ref[...]).astype(o_ref.dtype)


# ---------------------------------------------------------------------------
# Host-side setup (done once, outside the per-call hot path).
# ---------------------------------------------------------------------------
def prepare_params(w1, b1, w2, b2, w3, b3, *, compute_dtype=jnp.bfloat16):
    """Pad feature dims to multiples of 128 lanes and cast the weights once.

    Weights are (in, out) for y = x @ W + b.  Biases stay f32 (the bias/ReLU
    epilogue stays f32) and are presented as (1, D) rows.  Padding is skipped
    when a dim is already a multiple of 128.
    """
    cdt = jnp.dtype(compute_dtype)

    def pad_w(w):
        r, c = w.shape
        rp, cp = _round_up(r, 128), _round_up(c, 128)
        wc = w.astype(cdt)
        if (rp, cp) == (r, c):
            return wc
        return jnp.zeros((rp, cp), cdt).at[:r, :c].set(wc)

    def pad_b(b):
        c = b.shape[0]
        cp = _round_up(c, 128)
        bf = b.astype(jnp.float32)
        if cp == c:
            return bf.reshape(1, c)
        return jnp.zeros((1, cp), jnp.float32).at[0, :c].set(bf)

    return (pad_w(w1), pad_b(b1), pad_w(w2), pad_b(b2), pad_w(w3), pad_b(b3))


# ---------------------------------------------------------------------------
# Fused forward pass.
# ---------------------------------------------------------------------------
@functools.partial(jax.jit,
                   static_argnames=("d_out", "block_n", "single_buffer"))
def _two_layer_net_impl(x, w1p, b1p, w2p, b2p, w3p, b3p, *, d_out,
                        block_n=512, single_buffer=True):
    N, D_in = x.shape
    D_in_p, H1_p = w1p.shape
    H2_p = w2p.shape[1]
    D_out_p = w3p.shape[1]
    cdt = jnp.dtype(w1p.dtype)
    out_dtype = x.dtype
    ci = cdt.itemsize
    oi = jnp.dtype(out_dtype).itemsize

    # ---- batch tile: sublane-rounded (16 for packed bf16, 8 for f32) -------
    sub = 16 if ci < 4 else 8
    TN = min(block_n, _round_up(N, sub))
    # Prefer >= 2 grid steps so v7x can shard the "parallel" batch axis over
    # its two TensorCores; near-free elsewhere (~0.35 us per grid step).
    if N > 2 * sub and TN >= _round_up(N, sub):
        TN = _round_up(pl.cdiv(N, 2), sub)

    # ---- generation-aware VMEM budget ---------------------------------------
    cap = _vmem_capacity_bytes()
    w_bufs = 1 if single_buffer else 2
    weight_bytes = w_bufs * (
        (D_in_p * H1_p + H1_p * H2_p + H2_p * D_out_p) * ci
        + (H1_p + H2_p + D_out_p) * 4)

    def _need_bytes(tn):
        stream = 2 * tn * D_in_p * ci + 2 * tn * D_out_p * oi  # double-buffered
        scratch = tn * (H1_p + H2_p) * ci
        return stream + weight_bytes + scratch

    while TN > sub and _need_bytes(TN) > int(0.45 * cap):
        TN = max(sub, _round_up(TN // 2, sub))

    N_p = _round_up(N, TN)
    n_tiles = N_p // TN
    need = _need_bytes(TN)
    vmem_limit = int(min(max(2 * need, 4 * 1024 * 1024), int(0.9 * cap)))

    # Keep y1/y2 in vregs for small tiles; only stage through VMEM scratch
    # when the intermediates are big enough to cause vreg spills.
    use_scratch = TN * (H1_p + H2_p) * ci > 512 * 1024

    # ---- pad x (batch to a tile multiple, features to 128 lanes) -----------
    if (N_p, D_in_p) == (N, D_in) and x.dtype == cdt:
        xp = x
    else:
        xp = jnp.zeros((N_p, D_in_p), cdt).at[:N, :D_in].set(x.astype(cdt))

    # ---- block specs ---------------------------------------------------------
    def resident(shape):
        # Grid-invariant operands stay VMEM-resident; single-buffer them.
        if single_buffer:
            return pl.BlockSpec(shape, lambda i: (0, 0),
                                pipeline_mode=pl.Buffered(1))
        return pl.BlockSpec(shape, lambda i: (0, 0))

    in_specs = [
        pl.BlockSpec((TN, D_in_p), lambda i: (i, 0)),    # x streams over batch
        resident((D_in_p, H1_p)), resident((1, H1_p)),
        resident((H1_p, H2_p)), resident((1, H2_p)),
        resident((H2_p, D_out_p)), resident((1, D_out_p)),
    ]
    o_spec = pl.BlockSpec((TN, D_out_p), lambda i: (i, 0))

    if use_scratch:
        kernel = mlp_kernel_scratch
        scratch_shapes = [pltpu.VMEM((TN, H1_p), cdt),
                          pltpu.VMEM((TN, H2_p), cdt)]
    else:
        kernel = mlp_kernel_regs
        scratch_shapes = []

    flops = 2 * N_p * (D_in_p * H1_p + H1_p * H2_p + H2_p * D_out_p)
    bytes_accessed = (N_p * D_in_p * ci + N_p * D_out_p * oi
                      + (D_in_p * H1_p + H1_p * H2_p + H2_p * D_out_p) * ci
                      + (H1_p + H2_p + D_out_p) * 4)

    out_p = pl.pallas_call(
        kernel,
        out_shape=jax.ShapeDtypeStruct((N_p, D_out_p), out_dtype),
        grid_spec=pltpu.PrefetchScalarGridSpec(
            num_scalar_prefetch=0,
            grid=(n_tiles,),
            in_specs=in_specs,
            out_specs=o_spec,
            scratch_shapes=scratch_shapes,
        ),
        compiler_params=pltpu.CompilerParams(
            dimension_semantics=("parallel",),
            vmem_limit_bytes=vmem_limit,
        ),
        cost_estimate=pl.CostEstimate(flops=flops, transcendentals=0,
                                      bytes_accessed=bytes_accessed),
    )(xp, w1p, b1p, w2p, b2p, w3p, b3p)

    # Slice padding off.  out_p must never be consumed directly: padded batch
    # rows hold the net's response to a zero input, not zeros.
    return out_p[:N, :d_out]


def two_layer_net(x, padded_params, *, d_out, block_n=512):
    """Fused TwoLayerNet forward.  `padded_params` comes from prepare_params()."""
    try:
        return _two_layer_net_impl(x, *padded_params, d_out=d_out,
                                   block_n=block_n, single_buffer=True)
    except Exception:
        # Fallback for toolchains where single-buffering grid-invariant
        # operands via pl.Buffered(1) is not supported by the TPU pipeliner.
        return _two_layer_net_impl(x, *padded_params, d_out=d_out,
                                   block_n=block_n, single_buffer=False)


def init_params(key, D_in, H1, H2, D_out, dtype=jnp.float32):
    """PyTorch-style init: U(-1/sqrt(fan_in), 1/sqrt(fan_in)).

    Weights are returned already transposed to (in, out) for y = x @ W + b.
    """
    ks = jax.random.split(key, 6)

    def linear(kw, kb, fan_in, fan_out):
        bound = 1.0 / jnp.sqrt(jnp.asarray(fan_in, dtype))
        w = jax.random.uniform(kw, (fan_in, fan_out), dtype, -bound, bound)
        b = jax.random.uniform(kb, (fan_out,), dtype, -bound, bound)
        return w, b

    w1, b1 = linear(ks[0], ks[1], D_in, H1)
    w2, b2 = linear(ks[2], ks[3], H1, H2)
    w3, b3 = linear(ks[4], ks[5], H2, D_out)
    return w1, b1, w2, b2, w3, b3


if __name__ == "__main__":
    # Small shapes consistent with the module's forward: x is (batch, D_in).
    # At these sizes launch overhead dominates; the kernel is structured so the
    # same code path scales (batch tiling, lane padding, bf16 MXU, VMEM-resident
    # single-buffered weights).
    N, D_in, H1, H2, D_out = 8, 32, 64, 32, 8

    key = jax.random.PRNGKey(0)
    kx, kp = jax.random.split(key)
    x = jax.random.normal(kx, (N, D_in), dtype=jnp.float32)
    w1, b1, w2, b2, w3, b3 = init_params(kp, D_in, H1, H2, D_out)

    # Pure-JAX f32 reference.
    y1_ref = jnp.maximum(x @ w1 + b1, 0.0)
    y2_ref = jnp.maximum(y1_ref @ w2 + b2, 0.0)
    y_ref = y2_ref @ w3 + b3

    # f32 compute mode: exact (padding only adds zero terms).
    params_f32 = prepare_params(w1, b1, w2, b2, w3, b3,
                                compute_dtype=jnp.float32)
    y_f32 = two_layer_net(x, params_f32, d_out=D_out)
    y_f32 = jax.block_until_ready(y_f32)
    assert y_f32.shape == (N, D_out)
    assert jnp.allclose(y_f32, y_ref, atol=1e-5, rtol=1e-5)

    # bf16 MXU mode (fast path): f32 accumulation keeps the error at
    # bf16-operand level only.
    params_bf16 = prepare_params(w1, b1, w2, b2, w3, b3,
                                 compute_dtype=jnp.bfloat16)
    y_bf16 = two_layer_net(x, params_bf16, d_out=D_out)
    y_bf16 = jax.block_until_ready(y_bf16)
    assert y_bf16.shape == (N, D_out)
    assert jnp.allclose(y_bf16, y_ref, atol=5e-2, rtol=5e-2)

    # TODO(synk): optional fp8 (e4m3) weight path for v7x's fp8 MXU is not
    # implemented; bf16 is the portable fast path across v5e/v6e/v7x.
    print("KERNEL_OK")
</pallas_src>

<mosaic_0001>
module attributes {stable_mosaic.version = 11 : i64} {
  func.func @mlp_kernel_regs(%arg0: i32, %arg1: memref<8x128xf32, #tpu.memory_space<vmem>>, %arg2: memref<128x128xf32, #tpu.memory_space<vmem>>, %arg3: memref<1x128xf32, #tpu.memory_space<vmem>>, %arg4: memref<128x128xf32, #tpu.memory_space<vmem>>, %arg5: memref<1x128xf32, #tpu.memory_space<vmem>>, %arg6: memref<128x128xf32, #tpu.memory_space<vmem>>, %arg7: memref<1x128xf32, #tpu.memory_space<vmem>>, %arg8: memref<8x128xf32, #tpu.memory_space<vmem>>) attributes {dimension_semantics = [#tpu.dimension_semantics<parallel>], iteration_bounds = array<i64: 1>, scalar_prefetch = 0 : i64, scratch_operands = 0 : i64, tpu.core_type = #tpu.core_type<tc>, window_params = [{transform_indices = @transform_0, window_bounds = array<i64: 8, 128>}, {pipeline_mode = #tpu.pipeline_mode<synchronous>, transform_indices = @transform_1, window_bounds = array<i64: 128, 128>}, {pipeline_mode = #tpu.pipeline_mode<synchronous>, transform_indices = @transform_2, window_bounds = array<i64: 1, 128>}, {pipeline_mode = #tpu.pipeline_mode<synchronous>, transform_indices = @transform_3, window_bounds = array<i64: 128, 128>}, {pipeline_mode = #tpu.pipeline_mode<synchronous>, transform_indices = @transform_4, window_bounds = array<i64: 1, 128>}, {pipeline_mode = #tpu.pipeline_mode<synchronous>, transform_indices = @transform_5, window_bounds = array<i64: 128, 128>}, {pipeline_mode = #tpu.pipeline_mode<synchronous>, transform_indices = @transform_6, window_bounds = array<i64: 1, 128>}, {transform_indices = @transform_7, window_bounds = array<i64: 8, 128>}]} {
    %c0 = arith.constant 0 : index
    %c0_0 = arith.constant 0 : index
    %0 = vector.load %arg1[%c0, %c0_0] : memref<8x128xf32, #tpu.memory_space<vmem>>, vector<8x128xf32>
    %c0_1 = arith.constant 0 : index
    %c0_2 = arith.constant 0 : index
    %1 = vector.load %arg2[%c0_1, %c0_2] : memref<128x128xf32, #tpu.memory_space<vmem>>, vector<128x128xf32>
    %cst = arith.constant dense<0.000000e+00> : vector<8x128xf32>
    %2 = tpu.matmul %0, %1, %cst {dimension_numbers = #tpu.dot_dimension_numbers<[1], [0], [0], [1], [0, 0, 1, 1], [], []>} : vector<8x128xf32>, vector<128x128xf32>, vector<8x128xf32> -> vector<8x128xf32>
    %c0_3 = arith.constant 0 : index
    %c0_4 = arith.constant 0 : index
    %3 = vector.load %arg3[%c0_3, %c0_4] : memref<1x128xf32, #tpu.memory_space<vmem>>, vector<1x128xf32>
    %4 = vector.broadcast %3 : vector<1x128xf32> to vector<8x128xf32>
    %5 = arith.addf %2, %4 : vector<8x128xf32>
    %cst_5 = arith.constant 0.000000e+00 : f32
    %6 = vector.broadcast %cst_5 : f32 to vector<8x128xf32>
    %7 = arith.maximumf %5, %6 : vector<8x128xf32>
    %c0_6 = arith.constant 0 : index
    %c0_7 = arith.constant 0 : index
    %8 = vector.load %arg4[%c0_6, %c0_7] : memref<128x128xf32, #tpu.memory_space<vmem>>, vector<128x128xf32>
    %cst_8 = arith.constant dense<0.000000e+00> : vector<8x128xf32>
    %9 = tpu.matmul %7, %8, %cst_8 {dimension_numbers = #tpu.dot_dimension_numbers<[1], [0], [0], [1], [0, 0, 1, 1], [], []>} : vector<8x128xf32>, vector<128x128xf32>, vector<8x128xf32> -> vector<8x128xf32>
    %c0_9 = arith.constant 0 : index
    %c0_10 = arith.constant 0 : index
    %10 = vector.load %arg5[%c0_9, %c0_10] : memref<1x128xf32, #tpu.memory_space<vmem>>, vector<1x128xf32>
    %11 = vector.broadcast %10 : vector<1x128xf32> to vector<8x128xf32>
    %12 = arith.addf %9, %11 : vector<8x128xf32>
    %cst_11 = arith.constant 0.000000e+00 : f32
    %13 = vector.broadcast %cst_11 : f32 to vector<8x128xf32>
    %14 = arith.maximumf %12, %13 : vector<8x128xf32>
    %c0_12 = arith.constant 0 : index
    %c0_13 = arith.constant 0 : index
    %15 = vector.load %arg6[%c0_12, %c0_13] : memref<128x128xf32, #tpu.memory_space<vmem>>, vector<128x128xf32>
    %cst_14 = arith.constant dense<0.000000e+00> : vector<8x128xf32>
    %16 = tpu.matmul %14, %15, %cst_14 {dimension_numbers = #tpu.dot_dimension_numbers<[1], [0], [0], [1], [0, 0, 1, 1], [], []>} : vector<8x128xf32>, vector<128x128xf32>, vector<8x128xf32> -> vector<8x128xf32>
    %c0_15 = arith.constant 0 : index
    %c0_16 = arith.constant 0 : index
    %17 = vector.load %arg7[%c0_15, %c0_16] : memref<1x128xf32, #tpu.memory_space<vmem>>, vector<1x128xf32>
    %18 = vector.broadcast %17 : vector<1x128xf32> to vector<8x128xf32>
    %19 = arith.addf %16, %18 : vector<8x128xf32>
    %c0_17 = arith.constant 0 : index
    %c0_18 = arith.constant 0 : index
    %20 = vector.load %arg8[%c0_17, %c0_18] : memref<8x128xf32, #tpu.memory_space<vmem>>, vector<8x128xf32>
    tpu.vector_store %arg8[%c0_17, %c0_18], %19 {strides = array<i32>} : memref<8x128xf32, #tpu.memory_space<vmem>>, vector<8x128xf32>,
    return
  }
  func.func @transform_0(%arg0: i32) -> (i32, i32) {
    %c0_i32 = arith.constant 0 : i32
    %c0_i32_0 = arith.constant 0 : i32
    return %arg0, %c0_i32 : i32, i32
  }
  func.func @transform_1(%arg0: i32) -> (i32, i32) {
    %c0_i32 = arith.constant 0 : i32
    %c0_i32_0 = arith.constant 0 : i32
    %c0_i32_1 = arith.constant 0 : i32
    return %c0_i32, %c0_i32_0 : i32, i32
  }
  func.func @transform_2(%arg0: i32) -> (i32, i32) {
    %c0_i32 = arith.constant 0 : i32
    %c0_i32_0 = arith.constant 0 : i32
    %c0_i32_1 = arith.constant 0 : i32
    return %c0_i32, %c0_i32_0 : i32, i32
  }
  func.func @transform_3(%arg0: i32) -> (i32, i32) {
    %c0_i32 = arith.constant 0 : i32
    %c0_i32_0 = arith.constant 0 : i32
    %c0_i32_1 = arith.constant 0 : i32
    return %c0_i32, %c0_i32_0 : i32, i32
  }
  func.func @transform_4(%arg0: i32) -> (i32, i32) {
    %c0_i32 = arith.constant 0 : i32
    %c0_i32_0 = arith.constant 0 : i32
    %c0_i32_1 = arith.constant 0 : i32
    return %c0_i32, %c0_i32_0 : i32, i32
  }
  func.func @transform_5(%arg0: i32) -> (i32, i32) {
    %c0_i32 = arith.constant 0 : i32
    %c0_i32_0 = arith.constant 0 : i32
    %c0_i32_1 = arith.constant 0 : i32
    return %c0_i32, %c0_i32_0 : i32, i32
  }
  func.func @transform_6(%arg0: i32) -> (i32, i32) {
    %c0_i32 = arith.constant 0 : i32
    %c0_i32_0 = arith.constant 0 : i32
    %c0_i32_1 = arith.constant 0 : i32
    return %c0_i32, %c0_i32_0 : i32, i32
  }
  func.func @transform_7(%arg0: i32) -> (i32, i32) {
    %c0_i32 = arith.constant 0 : i32
    %c0_i32_0 = arith.constant 0 : i32
    return %arg0, %c0_i32 : i32, i32
  }
}

module attributes {stable_mosaic.version = 11 : i64} {
  func.func @mlp_kernel_regs(%arg0: i32, %arg1: memref<8x128xf32, #tpu.memory_space<vmem>>, %arg2: memref<128x128xf32, #tpu.memory_space<vmem>>, %arg3: memref<1x128xf32, #tpu.memory_space<vmem>>, %arg4: memref<128x128xf32, #tpu.memory_space<vmem>>, %arg5: memref<1x128xf32, #tpu.memory_space<vmem>>, %arg6: memref<128x128xf32, #tpu.memory_space<vmem>>, %arg7: memref<1x128xf32, #tpu.memory_space<vmem>>, %arg8: memref<8x128xf32, #tpu.memory_space<vmem>>) attributes {dimension_semantics = [#tpu.dimension_semantics<parallel>], iteration_bounds = array<i64: 1>, scalar_prefetch = 0 : i64, scratch_operands = 0 : i64, tpu.core_type = #tpu.core_type<tc>, window_params = [{transform_indices = @transform_0, window_bounds = array<i64: 8, 128>}, {pipeline_mode = #tpu.pipeline_mode<synchronous>, transform_indices = @transform_1, window_bounds = array<i64: 128, 128>}, {pipeline_mode = #tpu.pipeline_mode<synchronous>, transform_indices = @transform_2, window_bounds = array<i64: 1, 128>}, {pipeline_mode = #tpu.pipeline_mode<synchronous>, transform_indices = @transform_3, window_bounds = array<i64: 128, 128>}, {pipeline_mode = #tpu.pipeline_mode<synchronous>, transform_indices = @transform_4, window_bounds = array<i64: 1, 128>}, {pipeline_mode = #tpu.pipeline_mode<synchronous>, transform_indices = @transform_5, window_bounds = array<i64: 128, 128>}, {pipeline_mode = #tpu.pipeline_mode<synchronous>, transform_indices = @transform_6, window_bounds = array<i64: 1, 128>}, {transform_indices = @transform_7, window_bounds = array<i64: 8, 128>}]} {
    %c0 = arith.constant 0 : index
    %c0_0 = arith.constant 0 : index
    %0 = vector.load %arg1[%c0, %c0_0] : memref<8x128xf32, #tpu.memory_space<vmem>>, vector<8x128xf32>
    %c0_1 = arith.constant 0 : index
    %c0_2 = arith.constant 0 : index
    %1 = vector.load %arg2[%c0_1, %c0_2] : memref<128x128xf32, #tpu.memory_space<vmem>>, vector<128x128xf32>
    %cst = arith.constant dense<0.000000e+00> : vector<8x128xf32>
    %2 = tpu.matmul %0, %1, %cst {dimension_numbers = #tpu.dot_dimension_numbers<[1], [0], [0], [1], [0, 0, 1, 1], [], []>} : vector<8x128xf32>, vector<128x128xf32>, vector<8x128xf32> -> vector<8x128xf32>
    %c0_3 = arith.constant 0 : index
    %c0_4 = arith.constant 0 : index
    %3 = vector.load %arg3[%c0_3, %c0_4] : memref<1x128xf32, #tpu.memory_space<vmem>>, vector<1x128xf32>
    %4 = vector.broadcast %3 : vector<1x128xf32> to vector<8x128xf32>
    %5 = arith.addf %2, %4 : vector<8x128xf32>
    %cst_5 = arith.constant 0.000000e+00 : f32
    %6 = vector.broadcast %cst_5 : f32 to vector<8x128xf32>
    %7 = arith.maximumf %5, %6 : vector<8x128xf32>
    %c0_6 = arith.constant 0 : index
    %c0_7 = arith.constant 0 : index
    %8 = vector.load %arg4[%c0_6, %c0_7] : memref<128x128xf32, #tpu.memory_space<vmem>>, vector<128x128xf32>
    %cst_8 = arith.constant dense<0.000000e+00> : vector<8x128xf32>
    %9 = tpu.matmul %7, %8, %cst_8 {dimension_numbers = #tpu.dot_dimension_numbers<[1], [0], [0], [1], [0, 0, 1, 1], [], []>} : vector<8x128xf32>, vector<128x128xf32>, vector<8x128xf32> -> vector<8x128xf32>
    %c0_9 = arith.constant 0 : index
    %c0_10 = arith.constant 0 : index
    %10 = vector.load %arg5[%c0_9, %c0_10] : memref<1x128xf32, #tpu.memory_space<vmem>>, vector<1x128xf32>
    %11 = vector.broadcast %10 : vector<1x128xf32> to vector<8x128xf32>
    %12 = arith.addf %9, %11 : vector<8x128xf32>
    %cst_11 = arith.constant 0.000000e+00 : f32
    %13 = vector.broadcast %cst_11 : f32 to vector<8x128xf32>
    %14 = arith.maximumf %12, %13 : vector<8x128xf32>
    %c0_12 = arith.constant 0 : index
    %c0_13 = arith.constant 0 : index
    %15 = vector.load %arg6[%c0_12, %c0_13] : memref<128x128xf32, #tpu.memory_space<vmem>>, vector<128x128xf32>
    %cst_14 = arith.constant dense<0.000000e+00> : vector<8x128xf32>
    %16 = tpu.matmul %14, %15, %cst_14 {dimension_numbers = #tpu.dot_dimension_numbers<[1], [0], [0], [1], [0, 0, 1, 1], [], []>} : vector<8x128xf32>, vector<128x128xf32>, vector<8x128xf32> -> vector<8x128xf32>
    %c0_15 = arith.constant 0 : index
    %c0_16 = arith.constant 0 : index
    %17 = vector.load %arg7[%c0_15, %c0_16] : memref<1x128xf32, #tpu.memory_space<vmem>>, vector<1x128xf32>
    %18 = vector.broadcast %17 : vector<1x128xf32> to vector<8x128xf32>
    %19 = arith.addf %16, %18 : vector<8x128xf32>
    %c0_17 = arith.constant 0 : index
    %c0_18 = arith.constant 0 : index
    %20 = vector.load %arg8[%c0_17, %c0_18] : memref<8x128xf32, #tpu.memory_space<vmem>>, vector<8x128xf32>
    tpu.vector_store %arg8[%c0_17, %c0_18], %19 {strides = array<i32>} : memref<8x128xf32, #tpu.memory_space<vmem>>, vector<8x128xf32>,
    return
  }
  func.func @transform_0(%arg0: i32) -> (i32, i32) {
    %c0_i32 = arith.constant 0 : i32
    %c0_i32_0 = arith.constant 0 : i32
    return %arg0, %c0_i32 : i32, i32
  }
  func.func @transform_1(%arg0: i32) -> (i32, i32) {
    %c0_i32 = arith.constant 0 : i32
    %c0_i32_0 = arith.constant 0 : i32
    %c0_i32_1 = arith.constant 0 : i32
    return %c0_i32, %c0_i32_0 : i32, i32
  }
  func.func @transform_2(%arg0: i32) -> (i32, i32) {
    %c0_i32 = arith.constant 0 : i32
    %c0_i32_0 = arith.constant 0 : i32
    %c0_i32_1 = arith.constant 0 : i32
    return %c0_i32, %c0_i32_0 : i32, i32
  }
  func.func @transform_3(%arg0: i32) -> (i32, i32) {
    %c0_i32 = arith.constant 0 : i32
    %c0_i32_0 = arith.constant 0 : i32
    %c0_i32_1 = arith.constant 0 : i32
    return %c0_i32, %c0_i32_0 : i32, i32
  }
  func.func @transform_4(%arg0: i32) -> (i32, i32) {
    %c0_i32 = arith.constant 0 : i32
    %c0_i32_0 = arith.constant 0 : i32
    %c0_i32_1 = arith.constant 0 : i32
    return %c0_i32, %c0_i32_0 : i32, i32
  }
  func.func @transform_5(%arg0: i32) -> (i32, i32) {
    %c0_i32 = arith.constant 0 : i32
    %c0_i32_0 = arith.constant 0 : i32
    %c0_i32_1 = arith.constant 0 : i32
    return %c0_i32, %c0_i32_0 : i32, i32
  }
  func.func @transform_6(%arg0: i32) -> (i32, i32) {
    %c0_i32 = arith.constant 0 : i32
    %c0_i32_0 = arith.constant 0 : i32
    %c0_i32_1 = arith.constant 0 : i32
    return %c0_i32, %c0_i32_0 : i32, i32
  }
  func.func @transform_7(%arg0: i32) -> (i32, i32) {
    %c0_i32 = arith.constant 0 : i32
    %c0_i32_0 = arith.constant 0 : i32
    return %arg0, %c0_i32 : i32, i32
  }
}

</mosaic_0001>

<bundles_post_ra>
// kernel: _two_layer_net_impl.1
= control target key start
LH: loop header
LB: loop body
LE: loop exit
PB: predicated region body
PF: predicated region fallthrough
CT: control target
= control target key end

     0   :  { %12 = vsyncpa [#allocation3], 0  ;;  %s397_s0 = inlined_call_operand.vmem [shape: f32[8,128], index: 0, kind: input, shape index: {}]   ;;  %s398_s1 = inlined_call_operand.hbm [shape: f32[128,128], index: 1, kind: input, shape index: {}]   ;;  %s399_s2 = inlined_call_operand.vmem [shape: f32[1,128], index: 2, kind: input, shape index: {}]   ;;  %s400_s3 = inlined_call_operand.hbm [shape: f32[128,128], index: 3, kind: input, shape index: {}]   ;;  %s401_s4 = inlined_call_operand.vmem [shape: f32[1,128], index: 4, kind: input, shape index: {}]   ;;  %s402_s5 = inlined_call_operand.hbm [shape: f32[128,128], index: 5, kind: input, shape index: {}]   ;;  %s403_s6 = inlined_call_operand.vmem [shape: f32[1,128], index: 6, kind: input, shape index: {}]   ;;  %s404_s7 = inlined_call_operand.hbm [shape: f32[8,128], index: 7, kind: output, shape index: {}]  }
   0x1   :  { %13 = vsyncpa [#allocation6], 0 }
   0x2   :  { %14 = vsyncpa [#allocation4], 0  ;;  %s36_s26 = sshll.u32 %s400_s3, 4  ;;  %s327_s27 = smov [#allocation5]   ;;  %s37_s26 = int_to_ptr.hbm [resolvable:$true] %s36_s26 }
   0x3   :  { %s38_s28 = sshll.u32 %s327_s27, 4  ;;  %s21_s8 = sshll.u32 %s398_s1, 4  ;;  %s39_s28 = int_to_ptr.vmem [resolvable:$true] %s38_s28  ;;  %s22_s8 = int_to_ptr.hbm [resolvable:$true] %s21_s8 }
   0x4   :  { %s328_s9 = smov 128   ;;  %s329_s10 = smov 8  }
   0x5   :  { %44 = dma.hbm_to_vmem [thread:$0]  %s37_s26, 2048, %s39_s28, [#allocation6], %s328_s9, %s328_s9, %s329_s10  }
   0x6   :  { %s330_s11 = smov [#allocation2]   ;;  %s51_s15 = sshll.u32 %s402_s5, 4  ;;  %s52_s15 = int_to_ptr.hbm [resolvable:$true] %s51_s15 }
   0x7   :  { %s23_s12 = sshll.u32 %s330_s11, 4  ;;  %s331_s3 = smov [#allocation7]   ;;  %s24_s12 = int_to_ptr.vmem [resolvable:$true] %s23_s12 }
   0x8   :  { %29 = dma.hbm_to_vmem [thread:$0]  %s22_s8, 2048, %s24_s12, [#allocation3], %s328_s9, %s328_s9, %s329_s10  }
   0x9   :  { %s53_s16 = sshll.u32 %s331_s3, 4  ;;  %s54_s16 = int_to_ptr.vmem [resolvable:$true] %s53_s16 }
   0xa   :  { %59 = dma.hbm_to_vmem [thread:$0]  %s52_s15, 2048, %s54_s16, [#allocation6], %s328_s9, %s328_s9, %s329_s10  }
   0xb   :  { %321 = dma.done.wait [#allocation3], 2048  }
   0xc   :  { %322 = vsyncadd [#allocation3], 4294965248 }
   0xd   :  { %323 = dma.done.wait [#allocation6], 4096  }
   0xe   :  { %324 = vsyncadd [#allocation6], 4294963200  ;;  %v90_v0 = vld [vmem:[#allocation2 + $0x78] sm:$0xff]  ;;  %v89_v1 = vld [vmem:[#allocation2 + $0x70] sm:$0xff]  ;;  %s332_s21 = smov [#allocation8]   ;;  %s205_s25 = sshll.u32 %s404_s7, 4  ;;  %s206_s25 = int_to_ptr.hbm [resolvable:$true] %s205_s25 }
   0xf   :  { %95 = vmatpush.msra.mxu0 %v90_v0  ;;  %v88_v2 = vld [vmem:[#allocation2 + $0x68] sm:$0xff]  ;;  %v87_v3 = vld [vmem:[#allocation2 + $0x60] sm:$0xff]  ;;  %v131_v4 = vld [vmem:[#allocation5 + $0x78] sm:$0xff]  ;;  %s203_s22 = sshll.u32 %s332_s21, 4  ;;  %s204_s22 = int_to_ptr.vmem [resolvable:$true] %s203_s22 }
  0x10   :  { %v86_v5 = vld [vmem:[#allocation2 + $0x58] sm:$0xff]  ;;  %136 = vmatpush.msra.mxu1 %v131_v4  ;;  %v130_v6 = vld [vmem:[#allocation5 + $0x70] sm:$0xff]  ;;  %v129_v7 = vld [vmem:[#allocation5 + $0x68] sm:$0xff] }
  0x11   :  { %96 = vmatpush.msra.mxu0 %v89_v1  ;;  %v85_v8 = vld [vmem:[#allocation2 + $0x50] sm:$0xff]  ;;  %v128_v9 = vld [vmem:[#allocation5 + $0x60] sm:$0xff]  ;;  %v84_v10 = vld [vmem:[#allocation2 + $0x48] sm:$0xff] }
  0x12   :  { %137 = vmatpush.msra.mxu1 %v130_v6  ;;  %v127_v11 = vld [vmem:[#allocation5 + $0x58] sm:$0xff]  ;;  %v83_v12 = vld [vmem:[#allocation2 + $0x40] sm:$0xff]  ;;  %v126_v13 = vld [vmem:[#allocation5 + $0x50] sm:$0xff] }
  0x13   :  { %97 = vmatpush.msra.mxu0 %v88_v2  ;;  %v82_v14 = vld [vmem:[#allocation2 + $0x38] sm:$0xff]  ;;  %v125_v15 = vld [vmem:[#allocation5 + $0x48] sm:$0xff]  ;;  %v81_v16 = vld [vmem:[#allocation2 + $0x30] sm:$0xff] }
  0x14   :  { %138 = vmatpush.msra.mxu1 %v129_v7  ;;  %v124_v17 = vld [vmem:[#allocation5 + $0x40] sm:$0xff]  ;;  %v80_v18 = vld [vmem:[#allocation2 + $0x28] sm:$0xff]  ;;  %v123_v19 = vld [vmem:[#allocation5 + $0x38] sm:$0xff] }
  0x15   :  { %98 = vmatpush.msra.mxu0 %v87_v3  ;;  %v79_v20 = vld [vmem:[#allocation2 + $0x20] sm:$0xff]  ;;  %v122_v21 = vld [vmem:[#allocation5 + $0x30] sm:$0xff]  ;;  %v78_v22 = vld [vmem:[#allocation2 + $0x18] sm:$0xff] }
  0x16   :  { %139 = vmatpush.msra.mxu1 %v128_v9  ;;  %v121_v23 = vld [vmem:[#allocation5 + $0x28] sm:$0xff]  ;;  %v77_v24 = vld [vmem:[#allocation2 + $0x10] sm:$0xff]  ;;  %v120_v25 = vld [vmem:[#allocation5 + $0x20] sm:$0xff] }
  0x17   :  { %99 = vmatpush.msra.mxu0 %v86_v5  ;;  %v76_v26 = vld [vmem:[#allocation2 + $0x8] sm:$0xff]  ;;  %v119_v27 = vld [vmem:[#allocation5 + $0x18] sm:$0xff]  ;;  %v75_v28 = vld [vmem:[#allocation2] sm:$0xff] }
  0x18   :  { %140 = vmatpush.msra.mxu1 %v127_v11  ;;  %v74_v29 = vld [vmem:[%s397_s0] sm:$0xff]  ;;  %v118_v30 = vld [vmem:[#allocation5 + $0x10] sm:$0xff]  ;;  %v117_v31 = vld [vmem:[#allocation5 + $0x8] sm:$0xff] }
  0x19   :  { %100 = vmatpush.msra.mxu0 %v85_v8  ;;  %v116_v32 = vld [vmem:[#allocation5] sm:$0xff]  ;;  %v172_v33 = vld [vmem:[#allocation7 + $0x78] sm:$0xff]  ;;  %v171_v34 = vld [vmem:[#allocation7 + $0x70] sm:$0xff] }
  0x1a   :  { %141 = vmatpush.msra.mxu1 %v126_v13  ;;  %177 = vmatpush.msra.mxu2 %v172_v33  ;;  %v170_v35 = vld [vmem:[#allocation7 + $0x68] sm:$0xff]  ;;  %v169_v36 = vld [vmem:[#allocation7 + $0x60] sm:$0xff]  ;;  %v168_v37 = vld [vmem:[#allocation7 + $0x58] sm:$0xff] }
  0x1b   :  { %101 = vmatpush.msra.mxu0 %v84_v10  ;;  %v167_v38 = vld [vmem:[#allocation7 + $0x50] sm:$0xff]  ;;  %v166_v39 = vld [vmem:[#allocation7 + $0x48] sm:$0xff]  ;;  %v165_v40 = vld [vmem:[#allocation7 + $0x40] sm:$0xff] }
  0x1c   :  { %142 = vmatpush.msra.mxu1 %v125_v15  ;;  %178 = vmatpush.msra.mxu2 %v171_v34  ;;  %v164_v41 = vld [vmem:[#allocation7 + $0x38] sm:$0xff]  ;;  %v163_v42 = vld [vmem:[#allocation7 + $0x30] sm:$0xff]  ;;  %v162_v43 = vld [vmem:[#allocation7 + $0x28] sm:$0xff] }
  0x1d   :  { %102 = vmatpush.msra.mxu0 %v83_v12  ;;  %v161_v44 = vld [vmem:[#allocation7 + $0x20] sm:$0xff]  ;;  %v160_v45 = vld [vmem:[#allocation7 + $0x18] sm:$0xff]  ;;  %v159_v50 = vld [vmem:[#allocation7 + $0x10] sm:$0xff] }
  0x1e   :  { %143 = vmatpush.msra.mxu1 %v124_v17  ;;  %179 = vmatpush.msra.mxu2 %v170_v35  ;;  %v222_v46 = vld [vmem:[%s399_s2] ss:$0 sm:$0xff]  ;;  %v158_v51 = vld [vmem:[#allocation7 + $0x8] sm:$0xff] }
  0x1f   :  { %103 = vmatpush.msra.mxu0 %v82_v14  ;;  %v157_v52 = vld [vmem:[#allocation7] sm:$0xff] }
  0x20   :  { %144 = vmatpush.msra.mxu1 %v123_v19  ;;  %180 = vmatpush.msra.mxu2 %v169_v36  ;;  %v223_v53 = vld [vmem:[%s401_s4] ss:$0 sm:$0xff] }
  0x21   :  { %104 = vmatpush.msra.mxu0 %v81_v16  ;;  %v224_v57 = vld [vmem:[%s403_s6] ss:$0 sm:$0xff] }
  0x22   :  { %145 = vmatpush.msra.mxu1 %v122_v21  ;;  %181 = vmatpush.msra.mxu2 %v168_v37 }
  0x23   :  { %105 = vmatpush.msra.mxu0 %v80_v18 }
  0x24   :  { %146 = vmatpush.msra.mxu1 %v121_v23  ;;  %182 = vmatpush.msra.mxu2 %v167_v38 }
  0x25   :  { %106 = vmatpush.msra.mxu0 %v79_v20 }
  0x26   :  { %147 = vmatpush.msra.mxu1 %v120_v25  ;;  %183 = vmatpush.msra.mxu2 %v166_v39 }
  0x27   :  { %107 = vmatpush.msra.mxu0 %v78_v22 }
  0x28   :  { %148 = vmatpush.msra.mxu1 %v119_v27  ;;  %184 = vmatpush.msra.mxu2 %v165_v40 }
  0x29   :  { %108 = vmatpush.msra.mxu0 %v77_v24 }
  0x2a   :  { %149 = vmatpush.msra.mxu1 %v118_v30  ;;  %185 = vmatpush.msra.mxu2 %v164_v41 }
  0x2b   :  { %109 = vmatpush.msra.mxu0 %v76_v26 }
  0x2c   :  { %150 = vmatpush.msra.mxu1 %v117_v31  ;;  %186 = vmatpush.msra.mxu2 %v163_v42 }
  0x2d   :  { %110 = vmatpush.msra.mxu0 %v75_v28 }
  0x2e   :  { %111 = vmatmul.f32.vlgmr.msra.gmra.mxu0 %v74_v29  ;;  %151 = vmatpush.msra.mxu1 %v116_v32 }
  0x2f   :  { %187 = vmatpush.msra.mxu2 %v162_v43 }
  0x31   :  { %188 = vmatpush.msra.mxu2 %v161_v44 }
  0x33   :  { %189 = vmatpush.msra.mxu2 %v160_v45 }
  0x35   :  { %190 = vmatpush.msra.mxu2 %v159_v50 }
  0x37   :  { %191 = vmatpush.msra.mxu2 %v158_v51 }
  0x39   :  { %192 = vmatpush.msra.mxu2 %v157_v52 }
  0xab   :  { %v112_v47 = vpop.f32.mrf.mxu0 }
  0xac   :  { %v113_v48 = vadd.f32 %v222_v46, %v112_v47 }
  0xae   :  { %v115_v49 = vmax.f32 %v113_v48, 0.0 }
  0xb0   :  { %152 = vmatmul.f32.vlgmr.msra.gmra.mxu1 %v115_v49 }
 0x12d   :  { %v153_v54 = vpop.f32.mrf.mxu1 }
 0x12e   :  { %v154_v55 = vadd.f32 %v223_v53, %v153_v54 }
 0x130   :  { %v156_v56 = vmax.f32 %v154_v55, 0.0 }
 0x132   :  { %193 = vmatmul.f32.vlgmr.msra.gmra.mxu2 %v156_v56 }
 0x1b5   :  { %v194_v58 = vpop.f32.mrf.mxu2 }
 0x1b6   :  { %v195_v59 = vadd.f32 %v224_v57, %v194_v58 }
 0x1b8   :  { %197 = vst [vmem:[#allocation8] sm:$0xff] %v195_v59 }
 0x1b9   :  { %208 = dma.vmem_to_hbm [thread:$0]  %s204_s22, 128, %s206_s25, [#allocation4]  }
 0x1ba   :  { %325 = dma.done.wait [#allocation4], 128  }
 0x1bb   :  { %326 = vsyncadd [#allocation4], 4294967168 }
 0x1bc   :  { %213 = vsyncpa [#allocation3], 1 }
 0x1bd   :  { %214 = vsyncpa [#allocation6], 1 }
 0x1be   :  { %215 = vsyncpa [#allocation4], 1 }

// kernel: _two_layer_net_impl.1
= control target key start
LH: loop header
LB: loop body
LE: loop exit
PB: predicated region body
PF: predicated region fallthrough
CT: control target
= control target key end

     0   :  { %12 = vsyncpa [#allocation3], 0  ;;  %s397_s0 = inlined_call_operand.vmem [shape: f32[8,128], index: 0, kind: input, shape index: {}]   ;;  %s398_s1 = inlined_call_operand.hbm [shape: f32[128,128], index: 1, kind: input, shape index: {}]   ;;  %s399_s2 = inlined_call_operand.vmem [shape: f32[1,128], index: 2, kind: input, shape index: {}]   ;;  %s400_s3 = inlined_call_operand.hbm [shape: f32[128,128], index: 3, kind: input, shape index: {}]   ;;  %s401_s4 = inlined_call_operand.vmem [shape: f32[1,128], index: 4, kind: input, shape index: {}]   ;;  %s402_s5 = inlined_call_operand.hbm [shape: f32[128,128], index: 5, kind: input, shape index: {}]   ;;  %s403_s6 = inlined_call_operand.vmem [shape: f32[1,128], index: 6, kind: input, shape index: {}]   ;;  %s404_s7 = inlined_call_operand.hbm [shape: f32[8,128], index: 7, kind: output, shape index: {}]  }
   0x1   :  { %13 = vsyncpa [#allocation6], 0 }
   0x2   :  { %14 = vsyncpa [#allocation4], 0  ;;  %s36_s26 = sshll.u32 %s400_s3, 4  ;;  %s327_s27 = smov [#allocation5]   ;;  %s37_s26 = int_to_ptr.hbm [resolvable:$true] %s36_s26 }
   0x3   :  { %s38_s28 = sshll.u32 %s327_s27, 4  ;;  %s21_s8 = sshll.u32 %s398_s1, 4  ;;  %s39_s28 = int_to_ptr.vmem [resolvable:$true] %s38_s28  ;;  %s22_s8 = int_to_ptr.hbm [resolvable:$true] %s21_s8 }
   0x4   :  { %s328_s9 = smov 128   ;;  %s329_s10 = smov 8  }
   0x5   :  { %44 = dma.hbm_to_vmem [thread:$0]  %s37_s26, 2048, %s39_s28, [#allocation6], %s328_s9, %s328_s9, %s329_s10  }
   0x6   :  { %s330_s11 = smov [#allocation2]   ;;  %s51_s15 = sshll.u32 %s402_s5, 4  ;;  %s52_s15 = int_to_ptr.hbm [resolvable:$true] %s51_s15 }
   0x7   :  { %s23_s12 = sshll.u32 %s330_s11, 4  ;;  %s331_s3 = smov [#allocation7]   ;;  %s24_s12 = int_to_ptr.vmem [resolvable:$true] %s23_s12 }
   0x8   :  { %29 = dma.hbm_to_vmem [thread:$0]  %s22_s8, 2048, %s24_s12, [#allocation3], %s328_s9, %s328_s9, %s329_s10  }
   0x9   :  { %s53_s16 = sshll.u32 %s331_s3, 4  ;;  %s54_s16 = int_to_ptr.vmem [resolvable:$true] %s53_s16 }
   0xa   :  { %59 = dma.hbm_to_vmem [thread:$0]  %s52_s15, 2048, %s54_s16, [#allocation6], %s328_s9, %s328_s9, %s329_s10  }
   0xb   :  { %321 = dma.done.wait [#allocation3], 2048  }
   0xc   :  { %322 = vsyncadd [#allocation3], 4294965248 }
   0xd   :  { %323 = dma.done.wait [#allocation6], 4096  }
   0xe   :  { %324 = vsyncadd [#allocation6], 4294963200  ;;  %v90_v0 = vld [vmem:[#allocation2 + $0x78] sm:$0xff]  ;;  %v89_v1 = vld [vmem:[#allocation2 + $0x70] sm:$0xff]  ;;  %s332_s21 = smov [#allocation8]   ;;  %s205_s25 = sshll.u32 %s404_s7, 4  ;;  %s206_s25 = int_to_ptr.hbm [resolvable:$true] %s205_s25 }
   0xf   :  { %95 = vmatpush.msra.mxu0 %v90_v0  ;;  %v88_v2 = vld [vmem:[#allocation2 + $0x68] sm:$0xff]  ;;  %v87_v3 = vld [vmem:[#allocation2 + $0x60] sm:$0xff]  ;;  %v131_v4 = vld [vmem:[#allocation5 + $0x78] sm:$0xff]  ;;  %s203_s22 = sshll.u32 %s332_s21, 4  ;;  %s204_s22 = int_to_ptr.vmem [resolvable:$true] %s203_s22 }
  0x10   :  { %v86_v5 = vld [vmem:[#allocation2 + $0x58] sm:$0xff]  ;;  %136 = vmatpush.msra.mxu1 %v131_v4  ;;  %v130_v6 = vld [vmem:[#allocation5 + $0x70] sm:$0xff]  ;;  %v129_v7 = vld [vmem:[#allocation5 + $0x68] sm:$0xff] }
  0x11   :  { %96 = vmatpush.msra.mxu0 %v89_v1  ;;  %v85_v8 = vld [vmem:[#allocation2 + $0x50] sm:$0xff]  ;;  %v128_v9 = vld [vmem:[#allocation5 + $0x60] sm:$0xff]  ;;  %v84_v10 = vld [vmem:[#allocation2 + $0x48] sm:$0xff] }
  0x12   :  { %137 = vmatpush.msra.mxu1 %v130_v6  ;;  %v127_v11 = vld [vmem:[#allocation5 + $0x58] sm:$0xff]  ;;  %v83_v12 = vld [vmem:[#allocation2 + $0x40] sm:$0xff]  ;;  %v126_v13 = vld [vmem:[#allocation5 + $0x50] sm:$0xff] }
  0x13   :  { %97 = vmatpush.msra.mxu0 %v88_v2  ;;  %v82_v14 = vld [vmem:[#allocation2 + $0x38] sm:$0xff]  ;;  %v125_v15 = vld [vmem:[#allocation5 + $0x48] sm:$0xff]  ;;  %v81_v16 = vld [vmem:[#allocation2 + $0x30] sm:$0xff] }
  0x14   :  { %138 = vmatpush.msra.mxu1 %v129_v7  ;;  %v124_v17 = vld [vmem:[#allocation5 + $0x40] sm:$0xff]  ;;  %v80_v18 = vld [vmem:[#allocation2 + $0x28] sm:$0xff]  ;;  %v123_v19 = vld [vmem:[#allocation5 + $0x38] sm:$0xff] }
  0x15   :  { %98 = vmatpush.msra.mxu0 %v87_v3  ;;  %v79_v20 = vld [vmem:[#allocation2 + $0x20] sm:$0xff]  ;;  %v122_v21 = vld [vmem:[#allocation5 + $0x30] sm:$0xff]  ;;  %v78_v22 = vld [vmem:[#allocation2 + $0x18] sm:$0xff] }
  0x16   :  { %139 = vmatpush.msra.mxu1 %v128_v9  ;;  %v121_v23 = vld [vmem:[#allocation5 + $0x28] sm:$0xff]  ;;  %v77_v24 = vld [vmem:[#allocation2 + $0x10] sm:$0xff]  ;;  %v120_v25 = vld [vmem:[#allocation5 + $0x20] sm:$0xff] }
  0x17   :  { %99 = vmatpush.msra.mxu0 %v86_v5  ;;  %v76_v26 = vld [vmem:[#allocation2 + $0x8] sm:$0xff]  ;;  %v119_v27 = vld [vmem:[#allocation5 + $0x18] sm:$0xff]  ;;  %v75_v28 = vld [vmem:[#allocation2] sm:$0xff] }
  0x18   :  { %140 = vmatpush.msra.mxu1 %v127_v11  ;;  %v74_v29 = vld [vmem:[%s397_s0] sm:$0xff]  ;;  %v118_v30 = vld [vmem:[#allocation5 + $0x10] sm:$0xff]  ;;  %v117_v31 = vld [vmem:[#allocation5 + $0x8] sm:$0xff] }
  0x19   :  { %100 = vmatpush.msra.mxu0 %v85_v8  ;;  %v116_v32 = vld [vmem:[#allocation5] sm:$0xff]  ;;  %v172_v33 = vld [vmem:[#allocation7 + $0x78] sm:$0xff]  ;;  %v171_v34 = vld [vmem:[#allocation7 + $0x70] sm:$0xff] }
  0x1a   :  { %141 = vmatpush.msra.mxu1 %v126_v13  ;;  %177 = vmatpush.msra.mxu2 %v172_v33  ;;  %v170_v35 = vld [vmem:[#allocation7 + $0x68] sm:$0xff]  ;;  %v169_v36 = vld [vmem:[#allocation7 + $0x60] sm:$0xff]  ;;  %v168_v37 = vld [vmem:[#allocation7 + $0x58] sm:$0xff] }
  0x1b   :  { %101 = vmatpush.msra.mxu0 %v84_v10  ;;  %v167_v38 = vld [vmem:[#allocation7 + $0x50] sm:$0xff]  ;;  %v166_v39 = vld [vmem:[#allocation7 + $0x48] sm:$0xff]  ;;  %v165_v40 = vld [vmem:[#allocation7 + $0x40] sm:$0xff] }
  0x1c   :  { %142 = vmatpush.msra.mxu1 %v125_v15  ;;  %178 = vmatpush.msra.mxu2 %v171_v34  ;;  %v164_v41 = vld [vmem:[#allocation7 + $0x38] sm:$0xff]  ;;  %v163_v42 = vld [vmem:[#allocation7 + $0x30] sm:$0xff]  ;;  %v162_v43 = vld [vmem:[#allocation7 + $0x28] sm:$0xff] }
  0x1d   :  { %102 = vmatpush.msra.mxu0 %v83_v12  ;;  %v161_v44 = vld [vmem:[#allocation7 + $0x20] sm:$0xff]  ;;  %v160_v45 = vld [vmem:[#allocation7 + $0x18] sm:$0xff]  ;;  %v159_v50 = vld [vmem:[#allocation7 + $0x10] sm:$0xff] }
  0x1e   :  { %143 = vmatpush.msra.mxu1 %v124_v17  ;;  %179 = vmatpush.msra.mxu2 %v170_v35  ;;  %v222_v46 = vld [vmem:[%s399_s2] ss:$0 sm:$0xff]  ;;  %v158_v51 = vld [vmem:[#allocation7 + $0x8] sm:$0xff] }
  0x1f   :  { %103 = vmatpush.msra.mxu0 %v82_v14  ;;  %v157_v52 = vld [vmem:[#allocation7] sm:$0xff] }
  0x20   :  { %144 = vmatpush.msra.mxu1 %v123_v19  ;;  %180 = vmatpush.msra.mxu2 %v169_v36  ;;  %v223_v53 = vld [vmem:[%s401_s4] ss:$0 sm:$0xff] }
  0x21   :  { %104 = vmatpush.msra.mxu0 %v81_v16  ;;  %v224_v57 = vld [vmem:[%s403_s6] ss:$0 sm:$0xff] }
  0x22   :  { %145 = vmatpush.msra.mxu1 %v122_v21  ;;  %181 = vmatpush.msra.mxu2 %v168_v37 }
  0x23   :  { %105 = vmatpush.msra.mxu0 %v80_v18 }
  0x24   :  { %146 = vmatpush.msra.mxu1 %v121_v23  ;;  %182 = vmatpush.msra.mxu2 %v167_v38 }
  0x25   :  { %106 = vmatpush.msra.mxu0 %v79_v20 }
  0x26   :  { %147 = vmatpush.msra.mxu1 %v120_v25  ;;  %183 = vmatpush.msra.mxu2 %v166_v39 }
  0x27   :  { %107 = vmatpush.msra.mxu0 %v78_v22 }
  0x28   :  { %148 = vmatpush.msra.mxu1 %v119_v27  ;;  %184 = vmatpush.msra.mxu2 %v165_v40 }
  0x29   :  { %108 = vmatpush.msra.mxu0 %v77_v24 }
  0x2a   :  { %149 = vmatpush.msra.mxu1 %v118_v30  ;;  %185 = vmatpush.msra.mxu2 %v164_v41 }
  0x2b   :  { %109 = vmatpush.msra.mxu0 %v76_v26 }
  0x2c   :  { %150 = vmatpush.msra.mxu1 %v117_v31  ;;  %186 = vmatpush.msra.mxu2 %v163_v42 }
  0x2d   :  { %110 = vmatpush.msra.mxu0 %v75_v28 }
  0x2e   :  { %111 = vmatmul.f32.vlgmr.msra.gmra.mxu0 %v74_v29  ;;  %151 = vmatpush.msra.mxu1 %v116_v32 }
  0x2f   :  { %187 = vmatpush.msra.mxu2 %v162_v43 }
  0x31   :  { %188 = vmatpush.msra.mxu2 %v161_v44 }
  0x33   :  { %189 = vmatpush.msra.mxu2 %v160_v45 }
  0x35   :  { %190 = vmatpush.msra.mxu2 %v159_v50 }
  0x37   :  { %191 = vmatpush.msra.mxu2 %v158_v51 }
  0x39   :  { %192 = vmatpush.msra.mxu2 %v157_v52 }
  0xab   :  { %v112_v47 = vpop.f32.mrf.mxu0 }
  0xac   :  { %v113_v48 = vadd.f32 %v222_v46, %v112_v47 }
  0xae   :  { %v115_v49 = vmax.f32 %v113_v48, 0.0 }
  0xb0   :  { %152 = vmatmul.f32.vlgmr.msra.gmra.mxu1 %v115_v49 }
 0x12d   :  { %v153_v54 = vpop.f32.mrf.mxu1 }
 0x12e   :  { %v154_v55 = vadd.f32 %v223_v53, %v153_v54 }
 0x130   :  { %v156_v56 = vmax.f32 %v154_v55, 0.0 }
 0x132   :  { %193 = vmatmul.f32.vlgmr.msra.gmra.mxu2 %v156_v56 }
 0x1b5   :  { %v194_v58 = vpop.f32.mrf.mxu2 }
 0x1b6   :  { %v195_v59 = vadd.f32 %v224_v57, %v194_v58 }
 0x1b8   :  { %197 = vst [vmem:[#allocation8] sm:$0xff] %v195_v59 }
 0x1b9   :  { %208 = dma.vmem_to_hbm [thread:$0]  %s204_s22, 128, %s206_s25, [#allocation4]  }
 0x1ba   :  { %325 = dma.done.wait [#allocation4], 128  }
 0x1bb   :  { %326 = vsyncadd [#allocation4], 4294967168 }
 0x1bc   :  { %213 = vsyncpa [#allocation3], 1 }
 0x1bd   :  { %214 = vsyncpa [#allocation6], 1 }
 0x1be   :  { %215 = vsyncpa [#allocation4], 1 }

</bundles_post_ra>
